<compile_context>
chip_gen: v7x
topology: tpu7x:2x2x1
jax: 0.10.0
libtpu: 0.0.40
codegen_flags: <defaults>
</compile_context>

<pallas_src>
import jax
import jax.numpy as jnp
from jax.experimental import pallas as pl
from jax.experimental.pallas import tpu as pltpu  # noqa: F401  (TPU backend; params not needed for a gridless call)

N, C, D, H, W = 2, 5, 3, 6, 4
EPS = 1e-5


def _bn3d_kernel(params_ref, x_ref, o_ref):
    # params_ref: (C, 4) f32 columns = [weight, bias, running_mean, running_var].
    # x_ref / o_ref: (N, C, D*H*W) lane-dense slabs.
    w = params_ref[:, 0:1]          # (C, 1)
    b = params_ref[:, 1:2]          # (C, 1)
    m = params_ref[:, 2:3]          # (C, 1)
    v = params_ref[:, 3:4]          # (C, 1)

    inv_std = jax.lax.rsqrt(v + EPS)        # EUP slot (otherwise idle) — effectively free
    scale = w * inv_std                     # (C, 1)
    shift = b - m * scale                   # (C, 1)

    # Broadcast (1, C, 1) over (N, C, DHW): sublane-aligned channel column,
    # lane splat along the spatial axis, replicate over the batch axis.
    o_ref[...] = x_ref[...] * scale[None, :, :] + shift[None, :, :]


def pack_bn3d_params(weight, bias, running_mean, running_var):
    """Module-init-time packing: one (C, 4) f32 array [weight | bias | mean | var]."""
    return jnp.stack(
        [weight, bias, running_mean, running_var], axis=1
    ).astype(jnp.float32)


def batchnorm3d_eval(x, params):
    n, c, d, h, w = x.shape
    dhw = d * h * w

    x3d = x.reshape(n, c, dhw)  # pure reshape — lane-dense last dim (72)

    out3d = pl.pallas_call(
        _bn3d_kernel,
        out_shape=jax.ShapeDtypeStruct((n, c, dhw), x.dtype),
        # No grid: the entire problem fits trivially in VMEM; one invocation with
        # full-array blocks removes all per-step pipeline overhead.
        in_specs=[
            pl.BlockSpec((c, 4), lambda: (0, 0)),        # packed per-channel params
            pl.BlockSpec((n, c, dhw), lambda: (0, 0, 0)),  # x slab
        ],
        out_specs=pl.BlockSpec((n, c, dhw), lambda: (0, 0, 0)),
    )(params, x3d)

    return out3d.reshape(n, c, d, h, w)


if __name__ == "__main__":
    # Deterministic parameters mirroring the PyTorch module's __init__.
    running_mean = jnp.array([0.5, 0.4, 0.3, 0.2, 0.4], dtype=jnp.float32)
    running_var = jnp.array([3.0, 2.0, 4.0, 2.0, 3.0], dtype=jnp.float32)
    weight = jnp.array([3.0, 2.0, 4.0, 2.0, 3.0], dtype=jnp.float32)
    bias = jnp.array([0.5, 0.4, 0.3, 0.2, 0.4], dtype=jnp.float32)

    # Packed once, like module initialization (not per forward call).
    params = pack_bn3d_params(weight, bias, running_mean, running_var)

    key = jax.random.PRNGKey(0)
    x = jax.random.normal(key, (N, C, D, H, W), dtype=jnp.float32)

    out = jax.block_until_ready(batchnorm3d_eval(x, params))

    # Pure-JAX reference check (eval-mode BatchNorm3d semantics).
    inv_std = 1.0 / jnp.sqrt(running_var + EPS)
    ref = (x - running_mean[None, :, None, None, None]) * (
        weight * inv_std
    )[None, :, None, None, None] + bias[None, :, None, None, None]

    assert out.shape == (N, C, D, H, W)
    assert out.dtype == jnp.float32
    assert jnp.allclose(out, ref, atol=1e-4, rtol=1e-5)

    print("KERNEL_OK")
</pallas_src>

<mosaic_0001>
module attributes {stable_mosaic.version = 11 : i64} {
  func.func @_bn3d_kernel(%arg0: memref<5x4xf32, #tpu.memory_space<vmem>>, %arg1: memref<2x5x72xf32, #tpu.memory_space<vmem>>, %arg2: memref<2x5x72xf32, #tpu.memory_space<vmem>>) attributes {dimension_semantics = [], scalar_prefetch = 0 : i64, scratch_operands = 0 : i64, tpu.core_type = #tpu.core_type<tc>} {
    %c0 = arith.constant 0 : index
    %c0_0 = arith.constant 0 : index
    %0 = vector.load %arg0[%c0, %c0_0] : memref<5x4xf32, #tpu.memory_space<vmem>>, vector<5x1xf32>
    %c0_1 = arith.constant 0 : index
    %c1 = arith.constant 1 : index
    %1 = vector.load %arg0[%c0_1, %c1] : memref<5x4xf32, #tpu.memory_space<vmem>>, vector<5x1xf32>
    %c0_2 = arith.constant 0 : index
    %c2 = arith.constant 2 : index
    %2 = vector.load %arg0[%c0_2, %c2] : memref<5x4xf32, #tpu.memory_space<vmem>>, vector<5x1xf32>
    %c0_3 = arith.constant 0 : index
    %c3 = arith.constant 3 : index
    %3 = vector.load %arg0[%c0_3, %c3] : memref<5x4xf32, #tpu.memory_space<vmem>>, vector<5x1xf32>
    %cst = arith.constant 9.99999974E-6 : f32
    %4 = vector.broadcast %cst : f32 to vector<5x1xf32>
    %5 = arith.addf %3, %4 : vector<5x1xf32>
    %6 = math.rsqrt %5 : vector<5x1xf32>
    %7 = arith.mulf %0, %6 : vector<5x1xf32>
    %8 = arith.mulf %2, %7 : vector<5x1xf32>
    %9 = arith.subf %1, %8 : vector<5x1xf32>
    %c0_4 = arith.constant 0 : index
    %c0_5 = arith.constant 0 : index
    %c0_6 = arith.constant 0 : index
    %10 = vector.load %arg1[%c0_4, %c0_5, %c0_6] : memref<2x5x72xf32, #tpu.memory_space<vmem>>, vector<2x5x72xf32>
    %11 = vector.shape_cast %7 : vector<5x1xf32> to vector<1x5x1xf32>
    %12 = vector.broadcast %11 : vector<1x5x1xf32> to vector<2x5x72xf32>
    %13 = arith.mulf %10, %12 : vector<2x5x72xf32>
    %14 = vector.shape_cast %9 : vector<5x1xf32> to vector<1x5x1xf32>
    %15 = vector.broadcast %14 : vector<1x5x1xf32> to vector<2x5x72xf32>
    %16 = arith.addf %13, %15 : vector<2x5x72xf32>
    %c0_7 = arith.constant 0 : index
    %c0_8 = arith.constant 0 : index
    %c0_9 = arith.constant 0 : index
    %17 = vector.load %arg2[%c0_7, %c0_8, %c0_9] : memref<2x5x72xf32, #tpu.memory_space<vmem>>, vector<2x5x72xf32>
    tpu.vector_store %arg2[%c0_7, %c0_8, %c0_9], %16 {strides = array<i32>} : memref<2x5x72xf32, #tpu.memory_space<vmem>>, vector<2x5x72xf32>,
    return
  }
}

</mosaic_0001>

<bundles_post_ra>
// kernel: tpu_custom_call.1
= control target key start
LH: loop header
LB: loop body
LE: loop exit
PB: predicated region body
PF: predicated region fallthrough
CT: control target
= control target key end

     0   :  { %s60_s11 = smov 125   ;;  %v61_v3 = vmov 0   ;;  %s62_s12 = smov 2   ;;  %v63_v6 = vmov 1   ;;  %vm44_vm0 = vcmask 585728   ;;  %s95_s0 = inlined_call_operand.vmem [shape: f32[5,4], index: 0, kind: input, shape index: {}]   ;;  %s96_s1 = inlined_call_operand.vmem [shape: f32[2,5,72], index: 1, kind: input, shape index: {}]   ;;  %s97_s2 = inlined_call_operand.vmem [shape: f32[2,5,72], index: 2, kind: output, shape index: {}]  }
   0x1   :  { %v11_v0 = vld [vmem:[%s95_s0] sm:$0x1f]  ;;  %56 = vset.pattern.permute.xlu1 %v61_v3  ;;  %57 = vset.pattern.permute.xlu0 %v63_v6  ;;  %s64_s13 = smov 127   ;;  %v30_v12 = vld [vmem:[%s96_s1 + $0x8] sm:$0x1f] }
   0x2   :  { %v12_v1 = vadd.f32 1e-05, %v11_v0  ;;  %v29_v11 = vld [vmem:[%s96_s1] sm:$0x1f] }
   0x4   :  { %58 = vrsqrt.f32 %v12_v1 }
   0xe   :  { %v59_v2 = vpop.eup %58 }
   0xf   :  { %15 = vrot.lane.b32.xlu0 %v59_v2, %s60_s11 }
  0x81   :  { %v16_v4 = vpop.permute.xlu0 %15 }
  0x82   :  { %v18_v5 = vmul.f32 %v16_v4, %v11_v0 }
  0x84   :  { %20 = vrot.lane.b32.xlu0 %v18_v5, %s62_s12 }
  0xf6   :  { %v21_v7 = vpop.permute.xlu0 %20 }
  0xf7   :  { %v23_v8 = vmul.f32 %v21_v7, %v11_v0 }
  0xf9   :  { %25 = vrot.lane.b32.xlu1 %v23_v8, %s64_s13 }
  0xfd   :  { %32 = vperm.xlu1 %56, %v18_v5  }
 0x16b   :  { %v26_v9 = vpop.permute.xlu1 %25 }
 0x16c   :  { %v28_v10 = vsub.f32 %v11_v0, %v26_v9 }
 0x16e   :  { %39 = vperm.xlu0 %57, %v28_v10  }
 0x17c   :  { %v33_v13 = vpop.permute.xlu1 %32 }
 0x17d   :  { %v35_v14 = vmul.f32 %v33_v13, %v29_v11  ;;  %v36_v15 = vmul.f32 %v33_v13, %v30_v12 }
 0x1ed   :  { %v40_v16 = vpop.permute.xlu0 %39 }
 0x1ee   :  { %v42_v17 = vadd.f32 %v40_v16, %v35_v14  ;;  %v43_v18 = vadd.f32 %v40_v16, %v36_v15 }
 0x1f0   :  { %45 = vst.msk [vmem:[%s97_s2] sm:$0x1f] %vm44_vm0, %v42_v17  ;;  %46 = vst.msk [vmem:[%s97_s2 + $0x8] sm:$0x1f] %vm44_vm0, %v43_v18 }

</bundles_post_ra>
